<compile_context>
chip_gen: v6e
topology: v6e:2x2x1
jax: 0.10.0
libtpu: 0.0.40
codegen_flags: <defaults>
</compile_context>

<pallas_src>
import functools

import jax
import jax.numpy as jnp
from jax.experimental import pallas as pl
from jax.experimental.pallas import tpu as pltpu


# ---------------------------------------------------------------------------
# Fused kernel: whole MLP in one kernel body.
#   refs = (x_ref, w_in, b_in, [w_h, b_h]*n_layers, w_out, b_out, o_ref)
# All weights arrive pre-packed (block-diagonal) and in compute_dtype (bf16);
# biases arrive tiled and in f32.
# ---------------------------------------------------------------------------
def _rff_fused_kernel(*refs, n_layers, compute_dtype):
    x_ref = refs[0]
    o_ref = refs[-1]
    p = refs[1:-1]

    h = x_ref[...]  # (tb_p, P*din), compute_dtype

    # Input layer + hidden layers: relu(h @ W + b).  W is (P*in, P*out)
    # block-diagonal, so all P packed rows run at full 128-lane width on the
    # MXU; accumulation is f32, activations cast back to bf16 between layers.
    for layer in range(n_layers + 1):
        w = p[2 * layer][...]        # compute_dtype
        b = p[2 * layer + 1][...]    # f32
        h = jnp.maximum(
            jnp.dot(h, w, preferred_element_type=jnp.float32) + b, 0.0)
        h = h.astype(compute_dtype)  # MXU-native dtype for the next matmul

    w_out = p[-2][...]   # (P*F, P*n_outputs) block-diagonal, compute_dtype
    b_out = p[-1][...]   # (1, P*n_outputs), f32
    # Block-diagonal output matmul == per-group (32-lane) segmented reduce.
    y = jnp.dot(h, w_out, preferred_element_type=jnp.float32) + b_out

    # 2*sigmoid(y) - 1 == tanh(y/2): single EUP transcendental.
    o_ref[...] = jnp.tanh(0.5 * y).astype(o_ref.dtype)


# ---------------------------------------------------------------------------
# Wrapper: one pallas_call for the whole forward pass.
# ---------------------------------------------------------------------------
def rff_forward(params, x, *, max_block_rows=8192, compute_dtype=jnp.bfloat16):
    w_in, b_in = params["inputs"]        # (2F, F) pre-transposed, (1, F)
    hidden = params["hidden"]            # [((F, F), (1, F))] * n_layers
    w_out, b_out = params["outputs"]     # (n_outputs, F) torch layout, (1, n_outputs)
    n_layers = len(hidden)

    out_dtype = x.dtype
    B, din = x.shape
    F = w_in.shape[1]
    n_outputs = w_out.shape[0]

    # --- lane packing factor: fill the 128 lanes with P batch rows ----------
    P = max(1, 128 // max(F, 1))

    B_pad = ((B + P - 1) // P) * P
    if B_pad != B:
        x = jnp.pad(x, ((0, B_pad - B), (0, 0)))
    Bp = B_pad // P
    din_p = P * din
    F_p = P * F
    dout_p = P * n_outputs

    # Packed input: pure row-major view, cast to the MXU-native dtype.
    # (In a real pipeline x would already arrive in bf16 and the cast fuses
    #  upstream; the kernel then streams half the HBM bytes per row.)
    x_p = x.reshape(Bp, din_p).astype(compute_dtype)

    def block_diag(w):
        if P == 1:
            return w
        in_f, out_f = w.shape
        eye = jnp.eye(P, dtype=w.dtype)
        return jnp.einsum("ij,kl->ikjl", eye, w).reshape(P * in_f, P * out_f)

    def tile_bias(b):
        return b if P == 1 else jnp.tile(b, (1, P))

    flat = [block_diag(w_in).astype(compute_dtype),
            tile_bias(b_in).astype(jnp.float32)]
    for (w, b) in hidden:
        flat.append(block_diag(w).astype(compute_dtype))
        flat.append(tile_bias(b).astype(jnp.float32))
    flat.append(block_diag(w_out.T).astype(compute_dtype))
    flat.append(tile_bias(b_out).astype(jnp.float32))

    # --- batch tiling over packed rows ---------------------------------------
    tile_cap_p = max(8, (max_block_rows // P) // 8 * 8)
    if Bp <= tile_cap_p:
        if Bp >= 16:
            # Split into >=2 grid steps so both v7x TensorCores get work;
            # near-free on single-core v5e/v6e (~0.35 us/step).
            tb_p = min(((pl.cdiv(Bp, 2) + 7) // 8) * 8, Bp)
        else:
            tb_p = Bp  # single full block (equals full array dims)
    else:
        tb_p = tile_cap_p
    grid = (pl.cdiv(Bp, tb_p),)

    in_specs = [pl.BlockSpec((tb_p, din_p), lambda i: (i, 0))]
    for prm in flat:
        # Constant index_map -> weights stay resident in VMEM across the grid.
        # TODO(synk): pipeline_mode=pl.Buffered(1) would drop the redundant
        # second weight buffer; skipped (total weight footprint ~100 KiB).
        in_specs.append(pl.BlockSpec(prm.shape, lambda i: (0, 0)))
    out_spec = pl.BlockSpec((tb_p, dout_p), lambda i: (i, 0))

    # --- advisory cost estimate & explicit VMEM budget -----------------------
    flops = 2 * Bp * (din_p * F_p + n_layers * F_p * F_p + F_p * dout_p)
    param_bytes = sum(int(prm.size) * prm.dtype.itemsize for prm in flat)
    itemsize = jnp.dtype(compute_dtype).itemsize
    bytes_accessed = int(Bp * din_p * itemsize + param_bytes + Bp * dout_p * 4)

    vmem_bytes = (2 * tb_p * din_p * itemsize        # x double buffer
                  + 2 * tb_p * dout_p * 4            # out double buffer
                  + 2 * param_bytes                  # weights (double-buffered)
                  + 8 * tb_p * F_p * 4               # activation working set
                  + (4 << 20))                       # headroom
    vmem_limit = int(max(vmem_bytes, 32 << 20))

    kernel = functools.partial(_rff_fused_kernel, n_layers=n_layers,
                               compute_dtype=compute_dtype)
    out_packed = pl.pallas_call(
        kernel,
        out_shape=jax.ShapeDtypeStruct((Bp, dout_p), out_dtype),
        grid=grid,
        in_specs=in_specs,
        out_specs=out_spec,
        compiler_params=pltpu.CompilerParams(
            dimension_semantics=("parallel",),
            vmem_limit_bytes=vmem_limit),
        cost_estimate=pl.CostEstimate(
            flops=flops,
            transcendentals=Bp * dout_p,
            bytes_accessed=bytes_accessed),
    )(x_p, *flat)

    out = out_packed.reshape(B_pad, n_outputs)
    return out[:B] if B_pad != B else out


# ---------------------------------------------------------------------------
# Parameter init (deterministic, mimics torch.nn.Linear default uniform init).
# Input/hidden weights stored pre-transposed (in, out) for x @ W on the MXU;
# output weight kept in torch layout (out, in).
# ---------------------------------------------------------------------------
def init_linear(key, in_features, out_features, transpose=True):
    kw, kb = jax.random.split(key)
    bound = 1.0 / jnp.sqrt(jnp.float32(in_features))
    shape = (in_features, out_features) if transpose else (out_features, in_features)
    w = jax.random.uniform(kw, shape, jnp.float32, minval=-bound, maxval=bound)
    b = jax.random.uniform(kb, (1, out_features), jnp.float32,
                           minval=-bound, maxval=bound)
    return w, b


def init_rff_params(key, nfeature, n_layers, n_outputs=1):
    keys = jax.random.split(key, n_layers + 2)
    return {
        "inputs": init_linear(keys[0], 2 * nfeature, nfeature),
        "hidden": [init_linear(keys[1 + i], nfeature, nfeature)
                   for i in range(n_layers)],
        "outputs": init_linear(keys[-1], nfeature, n_outputs, transpose=False),
    }


# Pure-JAX f32 reference for correctness checking.
def rff_reference(params, x):
    w, b = params["inputs"]
    h = jnp.maximum(x @ w + b, 0.0)
    for (w, b) in params["hidden"]:
        h = jnp.maximum(h @ w + b, 0.0)
    w_out, b_out = params["outputs"]
    return 2.0 * jax.nn.sigmoid(h @ w_out.T + b_out) - 1.0


if __name__ == "__main__":
    nfeature = 32
    n_layers = 2
    n_outputs = 1
    batch = 8

    key = jax.random.PRNGKey(0)
    k_params, k_x = jax.random.split(key)
    params = init_rff_params(k_params, nfeature, n_layers, n_outputs)
    x = jax.random.normal(k_x, (batch, 2 * nfeature), jnp.float32)

    out = jax.jit(rff_forward)(params, x)
    out = jax.block_until_ready(out)

    ref = rff_reference(params, x)
    assert out.shape == (batch, n_outputs)
    # bf16 inputs/weights with f32 accumulation: loosened tolerance vs f32 ref.
    assert jnp.allclose(out, ref, atol=2e-2, rtol=2e-2)

    print("KERNEL_OK")
</pallas_src>

<mosaic_0001>
module attributes {stable_mosaic.version = 11 : i64} {
  func.func @_rff_fused_kernel(%arg0: i32, %arg1: memref<2x256xbf16, #tpu.memory_space<vmem>>, %arg2: memref<256x128xbf16, #tpu.memory_space<vmem>>, %arg3: memref<1x128xf32, #tpu.memory_space<vmem>>, %arg4: memref<128x128xbf16, #tpu.memory_space<vmem>>, %arg5: memref<1x128xf32, #tpu.memory_space<vmem>>, %arg6: memref<128x128xbf16, #tpu.memory_space<vmem>>, %arg7: memref<1x128xf32, #tpu.memory_space<vmem>>, %arg8: memref<128x4xbf16, #tpu.memory_space<vmem>>, %arg9: memref<1x4xf32, #tpu.memory_space<vmem>>, %arg10: memref<2x4xf32, #tpu.memory_space<vmem>>) attributes {dimension_semantics = [#tpu.dimension_semantics<parallel>], iteration_bounds = array<i64: 1>, scalar_prefetch = 0 : i64, scratch_operands = 0 : i64, tpu.core_type = #tpu.core_type<tc>, window_params = [{transform_indices = @transform_0, window_bounds = array<i64: 2, 256>}, {pipeline_mode = #tpu.pipeline_mode<synchronous>, transform_indices = @transform_1, window_bounds = array<i64: 256, 128>}, {pipeline_mode = #tpu.pipeline_mode<synchronous>, transform_indices = @transform_2, window_bounds = array<i64: 1, 128>}, {pipeline_mode = #tpu.pipeline_mode<synchronous>, transform_indices = @transform_3, window_bounds = array<i64: 128, 128>}, {pipeline_mode = #tpu.pipeline_mode<synchronous>, transform_indices = @transform_4, window_bounds = array<i64: 1, 128>}, {pipeline_mode = #tpu.pipeline_mode<synchronous>, transform_indices = @transform_5, window_bounds = array<i64: 128, 128>}, {pipeline_mode = #tpu.pipeline_mode<synchronous>, transform_indices = @transform_6, window_bounds = array<i64: 1, 128>}, {pipeline_mode = #tpu.pipeline_mode<synchronous>, transform_indices = @transform_7, window_bounds = array<i64: 128, 4>}, {pipeline_mode = #tpu.pipeline_mode<synchronous>, transform_indices = @transform_8, window_bounds = array<i64: 1, 4>}, {transform_indices = @transform_9, window_bounds = array<i64: 2, 4>}]} {
    %c0 = arith.constant 0 : index
    %c0_0 = arith.constant 0 : index
    %0 = vector.load %arg1[%c0, %c0_0] : memref<2x256xbf16, #tpu.memory_space<vmem>>, vector<2x256xbf16>
    %c0_1 = arith.constant 0 : index
    %c0_2 = arith.constant 0 : index
    %1 = vector.load %arg2[%c0_1, %c0_2] : memref<256x128xbf16, #tpu.memory_space<vmem>>, vector<256x128xbf16>
    %c0_3 = arith.constant 0 : index
    %c0_4 = arith.constant 0 : index
    %2 = vector.load %arg3[%c0_3, %c0_4] : memref<1x128xf32, #tpu.memory_space<vmem>>, vector<1x128xf32>
    %cst = arith.constant dense<0.000000e+00> : vector<2x128xf32>
    %3 = tpu.matmul %0, %1, %cst {dimension_numbers = #tpu.dot_dimension_numbers<[1], [0], [0], [1], [0, 0, 1, 1], [], []>} : vector<2x256xbf16>, vector<256x128xbf16>, vector<2x128xf32> -> vector<2x128xf32>
    %4 = vector.broadcast %2 : vector<1x128xf32> to vector<2x128xf32>
    %5 = arith.addf %3, %4 : vector<2x128xf32>
    %cst_5 = arith.constant 0.000000e+00 : f32
    %6 = vector.broadcast %cst_5 : f32 to vector<2x128xf32>
    %7 = arith.maximumf %5, %6 : vector<2x128xf32>
    %8 = arith.truncf %7 : vector<2x128xf32> to vector<2x128xbf16>
    %c0_6 = arith.constant 0 : index
    %c0_7 = arith.constant 0 : index
    %9 = vector.load %arg4[%c0_6, %c0_7] : memref<128x128xbf16, #tpu.memory_space<vmem>>, vector<128x128xbf16>
    %c0_8 = arith.constant 0 : index
    %c0_9 = arith.constant 0 : index
    %10 = vector.load %arg5[%c0_8, %c0_9] : memref<1x128xf32, #tpu.memory_space<vmem>>, vector<1x128xf32>
    %cst_10 = arith.constant dense<0.000000e+00> : vector<2x128xf32>
    %11 = tpu.matmul %8, %9, %cst_10 {dimension_numbers = #tpu.dot_dimension_numbers<[1], [0], [0], [1], [0, 0, 1, 1], [], []>} : vector<2x128xbf16>, vector<128x128xbf16>, vector<2x128xf32> -> vector<2x128xf32>
    %12 = vector.broadcast %10 : vector<1x128xf32> to vector<2x128xf32>
    %13 = arith.addf %11, %12 : vector<2x128xf32>
    %cst_11 = arith.constant 0.000000e+00 : f32
    %14 = vector.broadcast %cst_11 : f32 to vector<2x128xf32>
    %15 = arith.maximumf %13, %14 : vector<2x128xf32>
    %16 = arith.truncf %15 : vector<2x128xf32> to vector<2x128xbf16>
    %c0_12 = arith.constant 0 : index
    %c0_13 = arith.constant 0 : index
    %17 = vector.load %arg6[%c0_12, %c0_13] : memref<128x128xbf16, #tpu.memory_space<vmem>>, vector<128x128xbf16>
    %c0_14 = arith.constant 0 : index
    %c0_15 = arith.constant 0 : index
    %18 = vector.load %arg7[%c0_14, %c0_15] : memref<1x128xf32, #tpu.memory_space<vmem>>, vector<1x128xf32>
    %cst_16 = arith.constant dense<0.000000e+00> : vector<2x128xf32>
    %19 = tpu.matmul %16, %17, %cst_16 {dimension_numbers = #tpu.dot_dimension_numbers<[1], [0], [0], [1], [0, 0, 1, 1], [], []>} : vector<2x128xbf16>, vector<128x128xbf16>, vector<2x128xf32> -> vector<2x128xf32>
    %20 = vector.broadcast %18 : vector<1x128xf32> to vector<2x128xf32>
    %21 = arith.addf %19, %20 : vector<2x128xf32>
    %cst_17 = arith.constant 0.000000e+00 : f32
    %22 = vector.broadcast %cst_17 : f32 to vector<2x128xf32>
    %23 = arith.maximumf %21, %22 : vector<2x128xf32>
    %24 = arith.truncf %23 : vector<2x128xf32> to vector<2x128xbf16>
    %c0_18 = arith.constant 0 : index
    %c0_19 = arith.constant 0 : index
    %25 = vector.load %arg8[%c0_18, %c0_19] : memref<128x4xbf16, #tpu.memory_space<vmem>>, vector<128x4xbf16>
    %c0_20 = arith.constant 0 : index
    %c0_21 = arith.constant 0 : index
    %26 = vector.load %arg9[%c0_20, %c0_21] : memref<1x4xf32, #tpu.memory_space<vmem>>, vector<1x4xf32>
    %cst_22 = arith.constant dense<0.000000e+00> : vector<2x4xf32>
    %27 = tpu.matmul %24, %25, %cst_22 {dimension_numbers = #tpu.dot_dimension_numbers<[1], [0], [0], [1], [0, 0, 1, 1], [], []>} : vector<2x128xbf16>, vector<128x4xbf16>, vector<2x4xf32> -> vector<2x4xf32>
    %28 = vector.broadcast %26 : vector<1x4xf32> to vector<2x4xf32>
    %29 = arith.addf %27, %28 : vector<2x4xf32>
    %cst_23 = arith.constant 5.000000e-01 : f32
    %30 = vector.broadcast %cst_23 : f32 to vector<2x4xf32>
    %31 = arith.mulf %30, %29 : vector<2x4xf32>
    %32 = math.tanh %31 : vector<2x4xf32>
    %c0_24 = arith.constant 0 : index
    %c0_25 = arith.constant 0 : index
    %33 = vector.load %arg10[%c0_24, %c0_25] : memref<2x4xf32, #tpu.memory_space<vmem>>, vector<2x4xf32>
    tpu.vector_store %arg10[%c0_24, %c0_25], %32 {strides = array<i32>} : memref<2x4xf32, #tpu.memory_space<vmem>>, vector<2x4xf32>,
    return
  }
  func.func @transform_0(%arg0: i32) -> (i32, i32) {
    %c0_i32 = arith.constant 0 : i32
    %c0_i32_0 = arith.constant 0 : i32
    return %arg0, %c0_i32 : i32, i32
  }
  func.func @transform_1(%arg0: i32) -> (i32, i32) {
    %c0_i32 = arith.constant 0 : i32
    %c0_i32_0 = arith.constant 0 : i32
    %c0_i32_1 = arith.constant 0 : i32
    return %c0_i32, %c0_i32_0 : i32, i32
  }
  func.func @transform_2(%arg0: i32) -> (i32, i32) {
    %c0_i32 = arith.constant 0 : i32
    %c0_i32_0 = arith.constant 0 : i32
    %c0_i32_1 = arith.constant 0 : i32
    return %c0_i32, %c0_i32_0 : i32, i32
  }
  func.func @transform_3(%arg0: i32) -> (i32, i32) {
    %c0_i32 = arith.constant 0 : i32
    %c0_i32_0 = arith.constant 0 : i32
    %c0_i32_1 = arith.constant 0 : i32
    return %c0_i32, %c0_i32_0 : i32, i32
  }
  func.func @transform_4(%arg0: i32) -> (i32, i32) {
    %c0_i32 = arith.constant 0 : i32
    %c0_i32_0 = arith.constant 0 : i32
    %c0_i32_1 = arith.constant 0 : i32
    return %c0_i32, %c0_i32_0 : i32, i32
  }
  func.func @transform_5(%arg0: i32) -> (i32, i32) {
    %c0_i32 = arith.constant 0 : i32
    %c0_i32_0 = arith.constant 0 : i32
    %c0_i32_1 = arith.constant 0 : i32
    return %c0_i32, %c0_i32_0 : i32, i32
  }
  func.func @transform_6(%arg0: i32) -> (i32, i32) {
    %c0_i32 = arith.constant 0 : i32
    %c0_i32_0 = arith.constant 0 : i32
    %c0_i32_1 = arith.constant 0 : i32
    return %c0_i32, %c0_i32_0 : i32, i32
  }
  func.func @transform_7(%arg0: i32) -> (i32, i32) {
    %c0_i32 = arith.constant 0 : i32
    %c0_i32_0 = arith.constant 0 : i32
    %c0_i32_1 = arith.constant 0 : i32
    return %c0_i32, %c0_i32_0 : i32, i32
  }
  func.func @transform_8(%arg0: i32) -> (i32, i32) {
    %c0_i32 = arith.constant 0 : i32
    %c0_i32_0 = arith.constant 0 : i32
    %c0_i32_1 = arith.constant 0 : i32
    return %c0_i32, %c0_i32_0 : i32, i32
  }
  func.func @transform_9(%arg0: i32) -> (i32, i32) {
    %c0_i32 = arith.constant 0 : i32
    %c0_i32_0 = arith.constant 0 : i32
    return %arg0, %c0_i32 : i32, i32
  }
}

</mosaic_0001>

<bundles_post_ra>
// kernel: rff_forward.1
= control target key start
LH: loop header
LB: loop body
LE: loop exit
PB: predicated region body
PF: predicated region fallthrough
CT: control target
= control target key end

     0   :  { %v780_v1 = vmov 0.0   ;;  %v781_v7 = vmov 1966171168   ;;  %v85_v9 = vlaneseq  ;;  %vm782_vm0 = vmmov 0   ;;  %s1001_s1 = inlined_call_operand.vmem [shape: bf16[256,128], index: 1, kind: input, shape index: {}]   ;;  %s1002_s0 = inlined_call_operand.vmem [shape: bf16[2,256], index: 0, kind: input, shape index: {}]   ;;  %s1003_s3 = inlined_call_operand.vmem [shape: bf16[128,128], index: 3, kind: input, shape index: {}]   ;;  %s1004_s5 = inlined_call_operand.vmem [shape: bf16[128,128], index: 5, kind: input, shape index: {}]   ;;  %s1005_s2 = inlined_call_operand.vmem [shape: f32[1,128], index: 2, kind: input, shape index: {}]   ;;  %s1006_s7 = inlined_call_operand.vmem [shape: bf16[128,4], index: 7, kind: input, shape index: {}]   ;;  %s1007_s4 = inlined_call_operand.vmem [shape: f32[1,128], index: 4, kind: input, shape index: {}]   ;;  %s1008_s6 = inlined_call_operand.vmem [shape: f32[1,128], index: 6, kind: input, shape index: {}]   ;;  %s1009_s8 = inlined_call_operand.vmem [shape: f32[1,4], index: 8, kind: input, shape index: {}]   ;;  %s1010_s9 = inlined_call_operand.vmem [shape: f32[2,4], index: 9, kind: output, shape index: {}]  }
   0x1   :  { %v738_v0 = vld [vmem:[%s1001_s1 + $0x78] sm:$0xff]   ;;  %675 = vmatprep.subr.bf16.mxu1 %v780_v1  ;;  %v740_v3 = vld [vmem:[%s1001_s1 + $0x70] sm:$0xff]   ;;  %v742_v5 = vld [vmem:[%s1001_s1 + $0x68] sm:$0xff]   ;;  %v83_v8 = vunpack.c.l.s4 %v781_v7  ;;  %691 = vmatprep.mubr.msk.bf16.mxu1 %vm782_vm0, %v780_v1  ;;  %vm575_vm1 = vcmask 25600  }
   0x2   :  { %v739_v2 = vld [vmem:[%s1001_s1 + $0x38] sm:$0xff]   ;;  %626 = vmatprep.subr.bf16.mxu0 %v738_v0  ;;  %v741_v4 = vld [vmem:[%s1001_s1 + $0x30] sm:$0xff]   ;;  %v743_v6 = vld [vmem:[%s1001_s1 + $0x28] sm:$0xff]   ;;  %v86_v13 = vshrl.u32 %v85_v9, 7 }
   0x3   :  { %627 = vmatpush3.bf16.msra.mxu0 %v739_v2  ;;  %v744_v10 = vld [vmem:[%s1001_s1 + $0x60] sm:$0xff]   ;;  %v84_v12 = vunpack.c.0.s8 %v83_v8  ;;  %v746_v14 = vld [vmem:[%s1001_s1 + $0x58] sm:$0xff]   ;;  %v748_v16 = vld [vmem:[%s1001_s1 + $0x50] sm:$0xff]  }
   0x4   :  { %628 = vmatprep.subr.bf16.mxu0 %v740_v3  ;;  %v745_v11 = vld [vmem:[%s1001_s1 + $0x20] sm:$0xff]   ;;  %v747_v15 = vld [vmem:[%s1001_s1 + $0x18] sm:$0xff]   ;;  %v749_v21 = vld [vmem:[%s1001_s1 + $0x10] sm:$0xff]  }
   0x5   :  { %v87_v17 = vsub.s32 %v84_v12, %v86_v13  ;;  %v582_v18 = vld.sshfl [vmem:[%s1002_s0] sm:$0x11 pattern:$0x75316420]  ;;  %v754_v20 = vld [vmem:[%s1003_s3 + $0x38] sm:$0xff]   ;;  %v755_v23 = vld [vmem:[%s1003_s3 + $0x30] sm:$0xff]  }
   0x6   :  { %v81_v19 = vcombine.high %v582_v18, %v582_v18  ;;  %676 = vmatpush3.bf16.msra.mxu1 %v754_v20  ;;  %v750_v24 = vld [vmem:[%s1001_s1 + $0x48] sm:$0xff]   ;;  %v752_v27 = vld [vmem:[%s1001_s1 + $0x40] sm:$0xff]   ;;  %v758_v31 = vld [vmem:[%s1003_s3 + $0x18] sm:$0xff]  }
   0x7   :  { %629 = vmatpush3.bf16.msra.mxu0 %v741_v4  ;;  %677 = vmatprep.subr.bf16.mxu1 %v780_v1  ;;  %v751_v25 = vld [vmem:[%s1001_s1 + $0x8] sm:$0xff]   ;;  %v753_v28 = vld [vmem:[%s1001_s1] sm:$0xff]   ;;  %v88_v30 = vrot.slane %v582_v18, %v87_v17  ;;  %v759_v32 = vld [vmem:[%s1003_s3 + $0x10] sm:$0xff]  }
   0x8   :  { %630 = vmatprep.subr.bf16.mxu0 %v742_v5  ;;  %v95_v22 = vrot.slane %v81_v19, %v87_v17  ;;  %v756_v26 = vld [vmem:[%s1003_s3 + $0x28] sm:$0xff]   ;;  %v757_v29 = vld [vmem:[%s1003_s3 + $0x20] sm:$0xff]   ;;  %v762_v35 = vld [vmem:[%s1004_s5 + $0x38] sm:$0xff]  }
   0x9   :  { %v760_v33 = vld [vmem:[%s1003_s3 + $0x8] sm:$0xff]   ;;  %v761_v34 = vld [vmem:[%s1003_s3] sm:$0xff]   ;;  %v763_v36 = vld [vmem:[%s1004_s5 + $0x30] sm:$0xff]  }
   0xa   :  { %226 = vmatprep.mubr.bf16.mxu0 %v95_v22  ;;  %678 = vmatpush3.bf16.msra.mxu1 %v755_v23  ;;  %v764_v37 = vld [vmem:[%s1004_s5 + $0x28] sm:$0xff]   ;;  %v765_v38 = vld [vmem:[%s1004_s5 + $0x20] sm:$0xff]   ;;  %v766_v39 = vld [vmem:[%s1004_s5 + $0x18] sm:$0xff]  }
   0xb   :  { %631 = vmatpush3.bf16.msra.mxu0 %v743_v6  ;;  %679 = vmatprep.subr.bf16.mxu1 %v780_v1  ;;  %v767_v40 = vld [vmem:[%s1004_s5 + $0x10] sm:$0xff]   ;;  %v581_v42 = vld [vmem:[%s1005_s2] ss:$0 sm:$0xff]  ;;  %v768_v50 = vld [vmem:[%s1004_s5 + $0x8] sm:$0xff]  }
   0xc   :  { %632 = vmatprep.subr.bf16.mxu0 %v744_v10  ;;  %v769_v51 = vld [vmem:[%s1004_s5] sm:$0xff]   ;;  %v770_v52 = vld [vmem:[%s1006_s7 + $0x38] sm:$0xff]   ;;  %v771_v53 = vld [vmem:[%s1006_s7 + $0x30] sm:$0xff]  }
   0xd   :  { %v772_v54 = vld [vmem:[%s1006_s7 + $0x28] sm:$0xff]   ;;  %v773_v55 = vld [vmem:[%s1006_s7 + $0x20] sm:$0xff]   ;;  %v774_v56 = vld [vmem:[%s1006_s7 + $0x18] sm:$0xff]  }
   0xe   :  { %680 = vmatpush3.bf16.msra.mxu1 %v756_v26  ;;  %v775_v57 = vld [vmem:[%s1006_s7 + $0x10] sm:$0xff]   ;;  %v599_v58 = vld [vmem:[%s1007_s4] ss:$0 sm:$0xff]  ;;  %v776_v3 = vld [vmem:[%s1006_s7 + $0x8] sm:$0xff]  }
   0xf   :  { %633 = vmatpush3.bf16.msra.mxu0 %v745_v11  ;;  %681 = vmatprep.subr.bf16.mxu1 %v780_v1  ;;  %v777_v4 = vld [vmem:[%s1006_s7] sm:$0xff]  }
  0x10   :  { %634 = vmatprep.subr.bf16.mxu0 %v746_v14  ;;  %v608_v5 = vld [vmem:[%s1008_s6] ss:$0 sm:$0xff] }
  0x12   :  { %682 = vmatpush3.bf16.msra.mxu1 %v757_v29 }
  0x13   :  { %635 = vmatpush3.bf16.msra.mxu0 %v747_v15  ;;  %683 = vmatprep.subr.bf16.mxu1 %v780_v1 }
  0x14   :  { %636 = vmatprep.subr.bf16.mxu0 %v748_v16 }
  0x16   :  { %684 = vmatpush3.bf16.msra.mxu1 %v758_v31 }
  0x17   :  { %637 = vmatpush3.bf16.msra.mxu0 %v749_v21  ;;  %685 = vmatprep.subr.bf16.mxu1 %v780_v1 }
  0x18   :  { %638 = vmatprep.subr.bf16.mxu0 %v750_v24 }
  0x1a   :  { %686 = vmatpush3.bf16.msra.mxu1 %v759_v32 }
  0x1b   :  { %639 = vmatpush3.bf16.msra.mxu0 %v751_v25  ;;  %687 = vmatprep.subr.bf16.mxu1 %v780_v1 }
  0x1c   :  { %640 = vmatprep.subr.bf16.mxu0 %v752_v27 }
  0x1e   :  { %688 = vmatpush3.bf16.msra.mxu1 %v760_v33 }
  0x1f   :  { %641 = vmatpush3.bf16.msra.mxu0 %v753_v28  ;;  %689 = vmatprep.subr.bf16.mxu1 %v780_v1 }
  0x20   :  { %695 = vmatprep.subr.bf16.mxu0 %v780_v1 }
  0x22   :  { %227 = vmatmul.mubr.bf16.vlgmr.msra.gmra.mxu0 %v88_v30  ;;  %690 = vmatpush3.bf16.msra.mxu1 %v761_v34 }
  0x23   :  { %715 = vmatprep.subr.bf16.mxu1 %v780_v1  ;;  %711 = vmatprep.mubr.msk.bf16.mxu0 %vm782_vm0, %v780_v1 }
  0x24   :  { %696 = vmatpush3.bf16.msra.mxu0 %v762_v35 }
  0x25   :  { %697 = vmatprep.subr.bf16.mxu0 %v780_v1 }
  0x28   :  { %698 = vmatpush3.bf16.msra.mxu0 %v763_v36 }
  0x29   :  { %699 = vmatprep.subr.bf16.mxu0 %v780_v1 }
  0x2c   :  { %700 = vmatpush3.bf16.msra.mxu0 %v764_v37 }
  0x2d   :  { %701 = vmatprep.subr.bf16.mxu0 %v780_v1 }
  0x30   :  { %702 = vmatpush3.bf16.msra.mxu0 %v765_v38 }
  0x31   :  { %703 = vmatprep.subr.bf16.mxu0 %v780_v1 }
  0x34   :  { %704 = vmatpush3.bf16.msra.mxu0 %v766_v39 }
  0x35   :  { %705 = vmatprep.subr.bf16.mxu0 %v780_v1 }
  0x38   :  { %706 = vmatpush3.bf16.msra.mxu0 %v767_v40 }
  0x39   :  { %707 = vmatprep.subr.bf16.mxu0 %v780_v1 }
  0x3c   :  { %708 = vmatpush3.bf16.msra.mxu0 %v768_v50 }
  0x3d   :  { %709 = vmatprep.subr.bf16.mxu0 %v780_v1 }
  0x40   :  { %710 = vmatpush3.bf16.msra.mxu0 %v769_v51 }
  0xe2   :  { %v642_v41 = vpop.f32.mrf.mxu0 }
  0xe4   :  { %v643_v43 = vpop.f32.mrf.mxu0 }
  0xe5   :  { %v644_v44 = vadd.f32 %v643_v43, %v642_v41 }
  0xe6   :  { %v645_v45 = vpop.f32.mrf.mxu0 }
  0xe7   :  { %v229_v46 = vadd.f32 %v644_v44, %v581_v42 }
  0xe8   :  { %v646_v47 = vpop.f32.mrf.mxu0 }
  0xe9   :  { %v234_v48 = vmax.f32 %v229_v46, 0.0 }
  0xeb   :  { %v235_v49 = vpack.c.bf16 %v234_v48, %v234_v48 }
  0xed   :  { %692 = vmatmul.mubr.bf16.vlgmr.msra.gmra.mxu1 %v235_v49 }
  0xee   :  { %731 = vmatprep.mubr.msk.bf16.mxu1 %vm782_vm0, %v780_v1  ;;  %716 = vmatpush3.bf16.msra.mxu1 %v770_v52 }
  0xef   :  { %717 = vmatprep.subr.bf16.mxu1 %v780_v1 }
  0xf2   :  { %718 = vmatpush3.bf16.msra.mxu1 %v771_v53 }
  0xf3   :  { %719 = vmatprep.subr.bf16.mxu1 %v780_v1 }
  0xf6   :  { %720 = vmatpush3.bf16.msra.mxu1 %v772_v54 }
  0xf7   :  { %721 = vmatprep.subr.bf16.mxu1 %v780_v1 }
  0xfa   :  { %722 = vmatpush3.bf16.msra.mxu1 %v773_v55 }
  0xfb   :  { %723 = vmatprep.subr.bf16.mxu1 %v780_v1 }
  0xfe   :  { %724 = vmatpush3.bf16.msra.mxu1 %v774_v56 }
  0xff   :  { %725 = vmatprep.subr.bf16.mxu1 %v780_v1 }
 0x102   :  { %726 = vmatpush3.bf16.msra.mxu1 %v775_v57 }
 0x103   :  { %727 = vmatprep.subr.bf16.mxu1 %v780_v1 }
 0x106   :  { %728 = vmatpush3.bf16.msra.mxu1 %v776_v3 }
 0x107   :  { %729 = vmatprep.subr.bf16.mxu1 %v780_v1  ;;  %v617_v1 = vld [vmem:[%s1009_s8] ss:$0 sm:$0xff] }
 0x10a   :  { %730 = vmatpush3.bf16.msra.mxu1 %v777_v4 }
 0x1ad   :  { %v341_v59 = vpop.f32.mrf.mxu1 }
 0x1ae   :  { %v342_v60 = vadd.f32 %v599_v58, %v341_v59 }
 0x1af   :  { %v693_v61 = vpop.f32.mrf.mxu1 }
 0x1b0   :  { %v347_v62 = vmax.f32 %v342_v60, 0.0 }
 0x1b1   :  { %v344_v63 = vpop.f32.mrf.mxu1 }
 0x1b2   :  { %v348_v0 = vpack.c.bf16 %v347_v62, %v347_v62 }
 0x1b3   :  { %v694_v2 = vpop.f32.mrf.mxu1 }
 0x1b4   :  { %712 = vmatmul.mubr.bf16.vlgmr.msra.gmra.mxu0 %v348_v0 }
 0x274   :  { %v454_v6 = vpop.f32.mrf.mxu0 }
 0x275   :  { %v455_v7 = vadd.f32 %v608_v5, %v454_v6 }
 0x276   :  { %v713_v8 = vpop.f32.mrf.mxu0 }
 0x277   :  { %v460_v9 = vmax.f32 %v455_v7, 0.0 }
 0x278   :  { %v457_v10 = vpop.f32.mrf.mxu0 }
 0x279   :  { %v461_v11 = vpack.c.bf16 %v460_v9, %v460_v9 }
 0x27a   :  { %v714_v12 = vpop.f32.mrf.mxu0 }
 0x27b   :  { %732 = vmatmul.mubr.bf16.vlgmr.msra.gmra.mxu1 %v461_v11 }
 0x33b   :  { %v567_v13 = vpop.f32.mrf.mxu1 }
 0x33c   :  { %v568_v14 = vadd.f32 %v617_v1, %v567_v13 }
 0x33d   :  { %v733_v15 = vpop.f32.mrf.mxu1 }
 0x33e   :  { %v573_v16 = vmul.f32 0.5, %v568_v14 }
 0x33f   :  { %v570_v17 = vpop.f32.mrf.mxu1 }
 0x340   :  { %778 = vtanh.f32 %v573_v16 }
 0x341   :  { %v734_v18 = vpop.f32.mrf.mxu1 }
 0x34d   :  { %v779_v19 = vpop.eup %778 }
 0x34e   :  { %576 = vst.msk [vmem:[%s1010_s9] sm:$0x3] %vm575_vm1, %v779_v19 }

</bundles_post_ra>
